<compile_context>
chip_gen: v7x
topology: tpu7x:2x2x1
jax: 0.10.0
libtpu: 0.0.40
codegen_flags: <defaults>
</compile_context>

<pallas_src>
from functools import partial

import jax
import jax.numpy as jnp
from jax.experimental import pallas as pl
from jax.experimental.pallas import tpu as pltpu

INPUT_SIZE = 307
HIDDEN1 = 128
HIDDEN2 = 64


def _round_up(n, m):
    return ((n + m - 1) // m) * m


def siamese_mlp_kernel(x_ref, w1_ref, b1_ref, w2_ref, b2_ref, o_ref):
    # fc1: bf16 MXU matmul (ragged K=307 handled by Mosaic), f32 accumulate + bias + ReLU.
    x = x_ref[...].astype(jnp.bfloat16)
    h1 = jnp.dot(x, w1_ref[...], preferred_element_type=jnp.float32)
    h1 = jnp.maximum(h1 + b1_ref[...], 0.0)                       # b1: (1, 128) broadcasts
    # fc2: bf16 MXU matmul, f32 accumulate + bias + ReLU; store f32, 64 valid lanes only.
    h2 = jnp.dot(h1.astype(jnp.bfloat16), w2_ref[...],
                 preferred_element_type=jnp.float32)
    o_ref[...] = jnp.maximum(h2 + b2_ref[...], 0.0).astype(o_ref.dtype)


def prepare_params(w1, b1, w2, b2):
    """One-time param prep (outside the hot path): transpose to [in, out], cast weights
    to bf16. No K/N padding — ragged K=307 is handled in-kernel and the 64-wide output
    uses a masked store (HBM-bound kernel, vst slot has slack)."""
    w1_t = jnp.asarray(w1, jnp.float32).T.astype(jnp.bfloat16)    # [307, 128]
    w2_t = jnp.asarray(w2, jnp.float32).T.astype(jnp.bfloat16)    # [128, 64]
    b1_p = jnp.asarray(b1, jnp.float32)[None, :]                  # [1, 128]
    b2_p = jnp.asarray(b2, jnp.float32)[None, :]                  # [1, 64]
    return w1_t, b1_p, w2_t, b2_p


@partial(jax.jit, static_argnames=("batch_tile",))
def siamese_forward(x, params, *, batch_tile=1024):
    """x: [B, 307] float; params from prepare_params. Returns [B, 64] f32."""
    w1_t, b1_p, w2_t, b2_p = params
    B, F = x.shape
    assert F == INPUT_SIZE

    # Tiny-batch fallback only: block sublane dim must be a multiple of 8, so pad x when
    # B < 8 (at most 7 rows, negligible). For B >= 8, x goes in completely untouched.
    if B < 8:
        x_in = jnp.pad(x, ((0, 8 - B), (0, 0)))
        Bx = 8
    else:
        x_in = x
        Bx = B

    # Tile: multiple of 8, capped so the grid has >= 2 steps whenever the batch allows
    # (keeps both v7x TensorCores busy); default 1024 rows streams well on v5e/v6e.
    bt = max(8, min(batch_tile, _round_up(pl.cdiv(Bx, 2), 8)))
    grid = (pl.cdiv(Bx, bt),)

    out = pl.pallas_call(
        siamese_mlp_kernel,
        out_shape=jax.ShapeDtypeStruct((Bx, HIDDEN2), jnp.float32),
        grid_spec=pltpu.PrefetchScalarGridSpec(
            num_scalar_prefetch=0,
            grid=grid,
            in_specs=[
                pl.BlockSpec((bt, INPUT_SIZE), lambda i: (i, 0)),       # batch-tiled x (no pad)
                pl.BlockSpec((INPUT_SIZE, HIDDEN1), lambda i: (0, 0)),  # resident weights
                pl.BlockSpec((1, HIDDEN1), lambda i: (0, 0)),
                pl.BlockSpec((HIDDEN1, HIDDEN2), lambda i: (0, 0)),
                pl.BlockSpec((1, HIDDEN2), lambda i: (0, 0)),
            ],
            out_specs=pl.BlockSpec((bt, HIDDEN2), lambda i: (i, 0)),
        ),
        compiler_params=pltpu.CompilerParams(
            dimension_semantics=("parallel",),   # batch axis shards across TCs on v7x
        ),
    )(x_in, w1_t, b1_p, w2_t, b2_p)

    # No post-kernel copy in the normal case; only the B<8 fallback trims pad rows.
    return out if Bx == B else out[:B]


def init_params(key):
    """Deterministic init mimicking nn.Linear default (uniform +/- 1/sqrt(fan_in))."""
    k1, k2, k3, k4 = jax.random.split(key, 4)
    bound1 = 1.0 / jnp.sqrt(INPUT_SIZE)
    bound2 = 1.0 / jnp.sqrt(HIDDEN1)
    w1 = jax.random.uniform(k1, (HIDDEN1, INPUT_SIZE), jnp.float32, -bound1, bound1)
    b1 = jax.random.uniform(k2, (HIDDEN1,), jnp.float32, -bound1, bound1)
    w2 = jax.random.uniform(k3, (HIDDEN2, HIDDEN1), jnp.float32, -bound2, bound2)
    b2 = jax.random.uniform(k4, (HIDDEN2,), jnp.float32, -bound2, bound2)
    return w1, b1, w2, b2


if __name__ == "__main__":
    key = jax.random.PRNGKey(0)
    kx, kp = jax.random.split(key)

    batch = 16
    x = jax.random.normal(kx, (batch, INPUT_SIZE), jnp.float32)
    w1, b1, w2, b2 = init_params(kp)

    params = prepare_params(w1, b1, w2, b2)   # one-time prep, outside the hot path
    out = siamese_forward(x, params)
    out = jax.block_until_ready(out)
    assert out.shape == (batch, HIDDEN2)

    # Reference matching the kernel's numerics (bf16 MXU inputs, f32 accumulation).
    h1_ref = jnp.dot(x.astype(jnp.bfloat16), w1.T.astype(jnp.bfloat16),
                     preferred_element_type=jnp.float32)
    h1_ref = jnp.maximum(h1_ref + b1, 0.0)
    h2_ref = jnp.dot(h1_ref.astype(jnp.bfloat16), w2.T.astype(jnp.bfloat16),
                     preferred_element_type=jnp.float32)
    ref_bf16 = jnp.maximum(h2_ref + b2, 0.0)
    assert jnp.allclose(out, ref_bf16, atol=1e-4, rtol=1e-4), "mismatch vs bf16 reference"

    # Loose sanity check against the full-f32 PyTorch-equivalent math.
    ref_f32 = jnp.maximum(jnp.maximum(x @ w1.T + b1, 0.0) @ w2.T + b2, 0.0)
    assert jnp.allclose(out, ref_f32, atol=5e-2, rtol=5e-2), "mismatch vs f32 reference"

    print("KERNEL_OK")
</pallas_src>

<mosaic_0001>
module attributes {stable_mosaic.version = 11 : i64} {
  func.func @siamese_mlp_kernel(%arg0: i32, %arg1: memref<8x307xf32, #tpu.memory_space<vmem>>, %arg2: memref<307x128xbf16, #tpu.memory_space<vmem>>, %arg3: memref<1x128xf32, #tpu.memory_space<vmem>>, %arg4: memref<128x64xbf16, #tpu.memory_space<vmem>>, %arg5: memref<1x64xf32, #tpu.memory_space<vmem>>, %arg6: memref<8x64xf32, #tpu.memory_space<vmem>>) attributes {dimension_semantics = [#tpu.dimension_semantics<parallel>], iteration_bounds = array<i64: 2>, scalar_prefetch = 0 : i64, scratch_operands = 0 : i64, tpu.core_type = #tpu.core_type<tc>, window_params = [{transform_indices = @transform_0, window_bounds = array<i64: 8, 307>}, {pipeline_mode = #tpu.pipeline_mode<synchronous>, transform_indices = @transform_1, window_bounds = array<i64: 307, 128>}, {pipeline_mode = #tpu.pipeline_mode<synchronous>, transform_indices = @transform_2, window_bounds = array<i64: 1, 128>}, {pipeline_mode = #tpu.pipeline_mode<synchronous>, transform_indices = @transform_3, window_bounds = array<i64: 128, 64>}, {pipeline_mode = #tpu.pipeline_mode<synchronous>, transform_indices = @transform_4, window_bounds = array<i64: 1, 64>}, {transform_indices = @transform_5, window_bounds = array<i64: 8, 64>}]} {
    %c0 = arith.constant 0 : index
    %c0_0 = arith.constant 0 : index
    %0 = vector.load %arg1[%c0, %c0_0] : memref<8x307xf32, #tpu.memory_space<vmem>>, vector<8x307xf32>
    %1 = arith.truncf %0 : vector<8x307xf32> to vector<8x307xbf16>
    %c0_1 = arith.constant 0 : index
    %c0_2 = arith.constant 0 : index
    %2 = vector.load %arg2[%c0_1, %c0_2] : memref<307x128xbf16, #tpu.memory_space<vmem>>, vector<307x128xbf16>
    %cst = arith.constant dense<0.000000e+00> : vector<8x128xf32>
    %3 = tpu.matmul %1, %2, %cst {dimension_numbers = #tpu.dot_dimension_numbers<[1], [0], [0], [1], [0, 0, 1, 1], [], []>} : vector<8x307xbf16>, vector<307x128xbf16>, vector<8x128xf32> -> vector<8x128xf32>
    %c0_3 = arith.constant 0 : index
    %c0_4 = arith.constant 0 : index
    %4 = vector.load %arg3[%c0_3, %c0_4] : memref<1x128xf32, #tpu.memory_space<vmem>>, vector<1x128xf32>
    %5 = vector.broadcast %4 : vector<1x128xf32> to vector<8x128xf32>
    %6 = arith.addf %3, %5 : vector<8x128xf32>
    %cst_5 = arith.constant 0.000000e+00 : f32
    %7 = vector.broadcast %cst_5 : f32 to vector<8x128xf32>
    %8 = arith.maximumf %6, %7 : vector<8x128xf32>
    %9 = arith.truncf %8 : vector<8x128xf32> to vector<8x128xbf16>
    %c0_6 = arith.constant 0 : index
    %c0_7 = arith.constant 0 : index
    %10 = vector.load %arg4[%c0_6, %c0_7] : memref<128x64xbf16, #tpu.memory_space<vmem>>, vector<128x64xbf16>
    %cst_8 = arith.constant dense<0.000000e+00> : vector<8x64xf32>
    %11 = tpu.matmul %9, %10, %cst_8 {dimension_numbers = #tpu.dot_dimension_numbers<[1], [0], [0], [1], [0, 0, 1, 1], [], []>} : vector<8x128xbf16>, vector<128x64xbf16>, vector<8x64xf32> -> vector<8x64xf32>
    %c0_9 = arith.constant 0 : index
    %c0_10 = arith.constant 0 : index
    %12 = vector.load %arg5[%c0_9, %c0_10] : memref<1x64xf32, #tpu.memory_space<vmem>>, vector<1x64xf32>
    %13 = vector.broadcast %12 : vector<1x64xf32> to vector<8x64xf32>
    %14 = arith.addf %11, %13 : vector<8x64xf32>
    %cst_11 = arith.constant 0.000000e+00 : f32
    %15 = vector.broadcast %cst_11 : f32 to vector<8x64xf32>
    %16 = arith.maximumf %14, %15 : vector<8x64xf32>
    %c0_12 = arith.constant 0 : index
    %c0_13 = arith.constant 0 : index
    %17 = vector.load %arg6[%c0_12, %c0_13] : memref<8x64xf32, #tpu.memory_space<vmem>>, vector<8x64xf32>
    tpu.vector_store %arg6[%c0_12, %c0_13], %16 {strides = array<i32>} : memref<8x64xf32, #tpu.memory_space<vmem>>, vector<8x64xf32>,
    return
  }
  func.func @transform_0(%arg0: i32) -> (i32, i32) {
    %c0_i32 = arith.constant 0 : i32
    %c0_i32_0 = arith.constant 0 : i32
    return %arg0, %c0_i32 : i32, i32
  }
  func.func @transform_1(%arg0: i32) -> (i32, i32) {
    %c0_i32 = arith.constant 0 : i32
    %c0_i32_0 = arith.constant 0 : i32
    %c0_i32_1 = arith.constant 0 : i32
    return %c0_i32, %c0_i32_0 : i32, i32
  }
  func.func @transform_2(%arg0: i32) -> (i32, i32) {
    %c0_i32 = arith.constant 0 : i32
    %c0_i32_0 = arith.constant 0 : i32
    %c0_i32_1 = arith.constant 0 : i32
    return %c0_i32, %c0_i32_0 : i32, i32
  }
  func.func @transform_3(%arg0: i32) -> (i32, i32) {
    %c0_i32 = arith.constant 0 : i32
    %c0_i32_0 = arith.constant 0 : i32
    %c0_i32_1 = arith.constant 0 : i32
    return %c0_i32, %c0_i32_0 : i32, i32
  }
  func.func @transform_4(%arg0: i32) -> (i32, i32) {
    %c0_i32 = arith.constant 0 : i32
    %c0_i32_0 = arith.constant 0 : i32
    %c0_i32_1 = arith.constant 0 : i32
    return %c0_i32, %c0_i32_0 : i32, i32
  }
  func.func @transform_5(%arg0: i32) -> (i32, i32) {
    %c0_i32 = arith.constant 0 : i32
    %c0_i32_0 = arith.constant 0 : i32
    return %arg0, %c0_i32 : i32, i32
  }
}

</mosaic_0001>

<bundles_post_ra>
// kernel: siamese_forward.1
= control target key start
LH: loop header
LB: loop body
LE: loop exit
PB: predicated region body
PF: predicated region fallthrough
CT: control target
= control target key end

     0   :  { %10 = vsyncpa [#allocation3], 0  ;;  %s1210_s0 = inlined_call_operand.vmem [shape: f32[16,307], index: 0, kind: input, shape index: {}]   ;;  %s1211_s1 = inlined_call_operand.hbm [shape: bf16[307,128], index: 1, kind: input, shape index: {}]   ;;  %s1212_s2 = inlined_call_operand.vmem [shape: f32[1,128], index: 2, kind: input, shape index: {}]   ;;  %s1213_s3 = inlined_call_operand.vmem [shape: bf16[128,64], index: 3, kind: input, shape index: {}]   ;;  %s1214_s4 = inlined_call_operand.vmem [shape: f32[1,64], index: 4, kind: input, shape index: {}]   ;;  %s1215_s5 = inlined_call_operand.hbm [shape: f32[16,64], index: 5, kind: output, shape index: {}]  }
   0x1   :  { %11 = vsyncpa [#allocation4], 0 }
   0x2   :  { %13 = vsyncpa [#allocation4 + $0x1], 0  ;;  %s1028_s18 = smov 0   ;;  %s1030_s19 = smov 0  }
   0x3   :  { %s1032_s20 = smov 0   ;;  %s1034_s21 = smov 0  }
   0x4 LB: > { %s1049_s22 = sadd.s32 4294967295, %s989_s21   ;;  %s700_s23 = sadd.s32 4294967294, %s989_s21   ;;  %s989_s21 = sphi %s1034_s21, %s1231_s21   ;;  %s985_s20 = sphi %s1032_s20, %s1230_s20   ;;  %s981_s19 = sphi %s1030_s19, %s1229_s19   ;;  %s977_s18 = sphi %s1028_s18, %s1228_s18  }
   0x5   : > { %s1053_s24 = sadd.s32 1, %s989_s21   ;;  %s136_s25 = sadd.s32 1, %s985_s20 }
   0x6   : > { %s133_s26 = ssub.s32 %s989_s21, %s1053_s24  ;;  %p146_p0 = scmp.ne.s32.totalorder %s985_s20, %s981_s19 }
   0x7   : > { %p134_p1 = scmp.eq.s32.totalorder %s133_s26, 0  ;;  %p147_p2 = scmp.eq.s32.totalorder %s1049_s22, 1 }
   0x8   : > { %p152_p3 = scmp.ne.s32.totalorder %s981_s19, %s977_s18  ;;  %p153_p4 = scmp.eq.s32.totalorder %s700_s23, 1 }
   0x9   : > { %s1064_s27 = scalar_select %p134_p1, %s985_s20, %s136_s25  }
   0xa   : > { %p1066_p5 = por %p147_p2, %p146_p0  ;;  %p1070_p6 = por %p153_p4, %p152_p3 }
   0xb   : > { %p701_p7 = scmp.ge.s32.totalorder %s989_s21, 1  ;;  %p160_p8 = scmp.lt.s32.totalorder %s989_s21, 3 }
   0xc   : > { %s1219_s28 = scalar_select %p1066_p5, 1, 0 }
   0xd   : > { %s1220_s29 = scalar_select %p1070_p6, 1, 0 }
   0xe   : > { %p1216_p9 = scmp.eq.s32.totalorder %s1049_s22, 0  ;;  %p1077_p10 = pnand %p701_p7, %p160_p8 }
   0xf   : > { %s991_s6 = smov [#allocation2]   ;;  %s895_s11 = scalar_lea.hbm %s1211_s1, 2496 }
  0x10   : > { %s1221_s30 = scalar_select %p1077_p10, 1, 0 }
  0x11   : > { %s172_s7 = sshll.u32 %s991_s6, 4  ;;  %p818_p11 = pneg %p1077_p10  ;;  %s173_s7 = int_to_ptr.vmem [resolvable:$true] %s172_s7 }
  0x12   : > { %p896_p13 = scmp.ne.s32.totalorder %s1211_s1, %s895_s11  ;;  %p902_p3 = scmp.lt.u32.totalorder %s895_s11, %s1211_s1 }
  0x13   : > { %p1085_p12 = pnand %p1216_p9, %p818_p11 }
  0x15   : > { %p897_p0 = pneg %p1085_p12 }
  0x17   : > { %p898_p1 = pnand %p897_p0, %p896_p13 }
  0x19   : > { %p899_p2 = pneg %p898_p1 }
  0x1b   : > { %p904_p4 = pnand %p902_p3, %p899_p2 }
  0x1d   : > { %907 = shalt.err (!%p904_p4)
}
  0x1e   : > { %s908_s16 = scalar_lea.vmem %s173_s7, 2496  ;;  %p916_p9 = scmp.lt.s32.totalorder %s173_s7, %s173_s7 }
  0x1f   : > { %p909_p7 = scmp.ne.s32.totalorder %s173_s7, %s908_s16  ;;  %p917_p6 = scmp.lt.s32.totalorder %s908_s16, %s908_s16 }
  0x21   : > { %p911_p8 = pnand %p909_p7, %p897_p0  ;;  %p918_p5 = por %p917_p6, %p916_p9 }
  0x23   : > { %p912_p11 = pneg %p911_p8 }
  0x25   : > { %p919_p10 = pnand %p918_p5, %p912_p11 }
  0x27   : > { %922 = shalt.err (!%p919_p10)
}
  0x28   : > { %s992_s17 = smov 64   ;;  %s993_s23 = smov 4  }
  0x29   : > { %821 = dma.hbm_to_vmem [thread:$0]  (!%p1085_p12), %s1211_s1, 2496, %s173_s7, [#allocation3], %s992_s17, %s992_s17, %s993_s23  }
  0x2a   : > { %p1223_p13 = scmp.ne.s32.totalorder %s1221_s30, 0 }
  0x2b   : > { %p1224_p1 = scmp.eq.s32.totalorder (!%p1223_p13), %s1049_s22, 0 }
  0x2c   : > { %205 = sbr.rel (%p1223_p13) target bundleno = 539 (0x21b), region = 40 }
  0x33   : > { %968 = dma.done.wait (%p1224_p1), [#allocation3], 2496   ;;  %p1225_p0 = pmov %p1224_p1 }
  0x34   : > { %v994_v0 = vmov 0.0   ;;  %vm995_vm0 = vmmov 0   ;;  %v867_v1 = vld [vmem:[#allocation2 + $0x40] sm:$0xff]   ;;  %v869_v3 = vld [vmem:[#allocation2 + $0x48] sm:$0xff]   ;;  %v871_v5 = vld [vmem:[#allocation2 + $0x50] sm:$0xff]   ;;  %p233_p5 = scmp.lt.s32.totalorder %s1049_s22, 1 }
  0x35   : > { %970 = vsyncadd (%p1225_p0), [#allocation3], 4294964800  ;;  %779 = vmatprep.subr.bf16.mxu1 %v994_v0  ;;  %787 = vmatprep.mubr.msk.bf16.mxu1 %vm995_vm0, %v994_v0  ;;  %v868_v2 = vld [vmem:[#allocation2] sm:$0xff]   ;;  %v870_v4 = vld [vmem:[#allocation2 + $0x8] sm:$0xff]   ;;  %vm412_vm1 = vcmask 1040384   ;;  %vm413_vm2 = vcmask 1041408  }
  0x36   : > { %743 = vmatprep.subr.bf16.mxu0 %v867_v1  ;;  %v872_v6 = vld [vmem:[#allocation2 + $0x10] sm:$0xff]   ;;  %v873_v7 = vld [vmem:[#allocation2 + $0x58] sm:$0xff]   ;;  %s234_s30 = scalar_select %p233_p5, %s1049_s22, 1  ;;  %v877_v8 = vld [vmem:[#allocation2 + $0x80] sm:$0xff]   ;;  %v996_v15 = vmov 65535   ;;  %vm408_vm3 = vcmask 416768  }
  0x37   : > { %744 = vmatpush3.bf16.msra.mxu0 %v868_v2  ;;  %v874_v9 = vld [vmem:[#allocation2 + $0x18] sm:$0xff]   ;;  %v875_v10 = vld [vmem:[#allocation2 + $0x60] sm:$0xff]   ;;  %780 = vmatpush3.bf16.msra.mxu1 %v877_v8  ;;  %v880_v11 = vld [vmem:[#allocation2 + $0x88] sm:$0xff]   ;;  %v414_v16 = vsel %vm412_vm1, 4294967295, %v996_v15  ;;  %s230_s12 = sand.u32 1, %s981_s19   ;;  %s740_s16 = sshll.u32 %s1049_s22, 7 }
  0x38   : > { %745 = vmatprep.subr.bf16.mxu0 %v869_v3  ;;  %s811_s6 = smul.u32 24, %s234_s30  ;;  %781 = vmatprep.subr.bf16.mxu1 %v994_v0  ;;  %v876_v12 = vld [vmem:[#allocation2 + $0x20] sm:$0xff]   ;;  %v878_v13 = vld [vmem:[#allocation2 + $0x68] sm:$0xff]   ;;  %v883_v14 = vld [vmem:[#allocation2 + $0x90] sm:$0xff]   ;;  %v415_v20 = vsel %vm413_vm2, %v414_v16, 0  ;;  %s706_s13 = sshll.u32 %s230_s12, 3 }
  0x39   : > { %v879_v17 = vld [vmem:[#allocation2 + $0x28] sm:$0xff]   ;;  %v881_v18 = vld [vmem:[#allocation2 + $0x70] sm:$0xff]   ;;  %v886_v23 = vld [vmem:[#allocation2 + $0x98] ss:$0 sps:$4 sm:$0x33]   ;;  %s232_s17 = scalar_lea.vmem [#allocation5], %s706_s13  ;;  %s1168_s30 = scalar_lea.hbm %s1215_s5, %s740_s16 }
  0x3a   : > { %s237_s9 = scalar_lea.vmem %s1210_s0, %s811_s6  ;;  %v882_v24 = vld [vmem:[#allocation2 + $0x30] sm:$0xff]   ;;  %v417_v25 = vand.u32 %v886_v23, %v415_v20  ;;  %v884_v26 = vld [vmem:[#allocation2 + $0x78] sm:$0xff]   ;;  %v887_v28 = vld [vmem:[%s1213_s3] sm:$0xff]   ;;  %s629_s23 = sshll.u32 %s232_s17, 4  ;;  %vm613_vm4 = vcmask 523264   ;;  %s1170_s23 = int_to_ptr.vmem [resolvable:$true] %s629_s23 }
  0x3b   : > { %746 = vmatpush3.bf16.msra.mxu0 %v870_v4  ;;  %782 = vmatpush3.bf16.msra.mxu1 %v880_v11  ;;  %v240_v19 = vld [vmem:[%s237_s9 + $0x8] sm:$0xff]  ;;  %v241_v21 = vld [vmem:[%s237_s9 + $0x10] sm:$0xff]  ;;  %v885_v29 = vld [vmem:[#allocation2 + $0x38] sm:$0xff]   ;;  %s616_s22 = scalar_lea.sflag [#allocation4], %s230_s12  ;;  %s923_s6 = scalar_lea.vmem %s1170_s23, 128 }
  0x3c   : > { %747 = vmatprep.subr.bf16.mxu0 %v871_v5  ;;  %783 = vmatprep.subr.bf16.mxu1 %v994_v0  ;;  %v243_v22 = vpack.c.bf16 %v240_v19, %v240_v19  ;;  %v244_v27 = vpack.c.bf16 %v241_v21, %v241_v21  ;;  %v239_v30 = vld [vmem:[%s237_s9] sm:$0xff]  ;;  %v888_v31 = vld [vmem:[%s1213_s3 + $0x8] sm:$0xff]   ;;  %v889_v33 = vld [vmem:[%s1213_s3 + $0x10] sm:$0xff]   ;;  %p924_p6 = scmp.ne.s32.totalorder %s1170_s23, %s923_s6  ;;  %p1226_p9 = scmp.ne.s32.totalorder %s1219_s28, 0 }
  0x3d   : > { %v242_v32 = vpack.c.bf16 %v239_v30, %v239_v30  ;;  %v890_v34 = vld [vmem:[%s1213_s3 + $0x18] sm:$0xff]   ;;  %v891_v35 = vld [vmem:[%s1213_s3 + $0x20] sm:$0xff]   ;;  %v892_v36 = vld [vmem:[%s1213_s3 + $0x28] sm:$0xff]   ;;  %s997_s7 = smov [#allocation5]  }
  0x3e   : > { %451 = vmatprep.mubr.bf16.mxu0 %v243_v22  ;;  %v893_v37 = vld [vmem:[%s1213_s3 + $0x30] sm:$0xff]   ;;  %v894_v38 = vld [vmem:[%s1213_s3 + $0x38] sm:$0xff]   ;;  %v708_v45 = vld [vmem:[%s1212_s2] ss:$0 sm:$0xff]  ;;  %p925_p10 = pnand %p924_p6, %p1226_p9  ;;  %s927_s8 = sshll.u32 %s997_s7, 4  ;;  %s928_s8 = int_to_ptr.vmem [resolvable:$false] %s927_s8 }
  0x3f   : > { %748 = vmatpush3.bf16.msra.mxu0 %v872_v6  ;;  %784 = vmatpush3.bf16.msra.mxu1 %v883_v14  ;;  %v730_v53 = vld [vmem:[%s1214_s4] ss:$0 sm:$0xff]  ;;  %s929_s9 = scalar_lea.vmem %s928_s8, 256  ;;  %p930_p2 = scmp.lt.s32.totalorder %s1170_s23, %s928_s8 }
  0x40   : > { %749 = vmatprep.subr.bf16.mxu0 %v873_v7  ;;  %785 = vmatprep.subr.bf16.mxu1 %v994_v0  ;;  %p926_p12 = pneg %p925_p10  ;;  %p931_p3 = scmp.lt.s32.totalorder %s929_s9, %s923_s6 }
  0x42   : > { %p932_p4 = por %p931_p3, %p930_p2 }
  0x43   : > { %750 = vmatpush3.bf16.msra.mxu0 %v874_v9  ;;  %786 = vmatpush3.bf16.msra.mxu1 %v417_v25 }
  0x44   : > { %751 = vmatprep.subr.bf16.mxu0 %v875_v10  ;;  %791 = vmatprep.subr.bf16.mxu1 %v994_v0  ;;  %p933_p7 = pnand %p932_p4, %p926_p12 }
  0x46   : > { %788 = vmatmul.mubr.msk.bf16.vlgmr.msra.gmra.mrb[0].mxu1 %vm408_vm3, %v244_v27 }
  0x47   : > { %752 = vmatpush3.bf16.msra.mxu0 %v876_v12  ;;  %792 = vmatpush3.bf16.msra.mxu1 %v887_v28 }
  0x48   : > { %753 = vmatprep.subr.bf16.mxu0 %v878_v13  ;;  %793 = vmatprep.subr.bf16.mxu1 %v994_v0 }
  0x49   : > { %807 = vmatprep.mubr.msk.bf16.mxu1 %vm995_vm0, %v994_v0 }
  0x4b   : > { %754 = vmatpush3.bf16.msra.mxu0 %v879_v17  ;;  %794 = vmatpush3.bf16.msra.mxu1 %v888_v31 }
  0x4c   : > { %755 = vmatprep.subr.bf16.mxu0 %v881_v18  ;;  %795 = vmatprep.subr.bf16.mxu1 %v994_v0 }
  0x4f   : > { %756 = vmatpush3.bf16.msra.mxu0 %v882_v24  ;;  %796 = vmatpush3.bf16.msra.mxu1 %v889_v33 }
  0x50   : > { %757 = vmatprep.subr.bf16.mxu0 %v884_v26  ;;  %797 = vmatprep.subr.bf16.mxu1 %v994_v0 }
  0x53   : > { %758 = vmatpush3.bf16.msra.mxu0 %v885_v29  ;;  %798 = vmatpush3.bf16.msra.mxu1 %v890_v34 }
  0x54   : > { %799 = vmatprep.subr.bf16.mxu1 %v994_v0 }
  0x56   : > { %452 = vmatmul.mubr.bf16.vlgmr.msra.gmra.mrb[0].mxu0 %v242_v32 }
  0x57   : > { %800 = vmatpush3.bf16.msra.mxu1 %v891_v35 }
  0x58   : > { %801 = vmatprep.subr.bf16.mxu1 %v994_v0 }
  0x5b   : > { %802 = vmatpush3.bf16.msra.mxu1 %v892_v36 }
  0x5c   : > { %803 = vmatprep.subr.bf16.mxu1 %v994_v0 }
  0x5f   : > { %804 = vmatpush3.bf16.msra.mxu1 %v893_v37 }
  0x60   : > { %805 = vmatprep.subr.bf16.mxu1 %v994_v0 }
  0x63   : > { %806 = vmatpush3.bf16.msra.mxu1 %v894_v38 }
 0x119   : > { %v493_v39 = vpop.f32.mrb[0].mxu1 }
 0x11a   : > { %v789_v40 = vpop.f32.mrb[1].mxu1 }
 0x11b   : > { %v496_v41 = vpop.f32.mrb[2].mxu1 }
 0x11c   : > { %v790_v42 = vpop.f32.mrb[3].mxu1 }
 0x129   : > { %v759_v43 = vpop.f32.mrb[0].mxu0 }
 0x12a   : > { %v760_v44 = vpop.f32.mrb[1].mxu0 }
 0x12b   : > { %v761_v46 = vadd.f32 %v760_v44, %v759_v43  ;;  %v762_v47 = vpop.f32.mrb[2].mxu0 }
 0x12c   : > { %v763_v48 = vpop.f32.mrb[3].mxu0 }
 0x12d   : > { %v454_v49 = vadd.f32 %v761_v46, %v708_v45 }
 0x12f   : > { %v494_v50 = vadd.f32 %v493_v39, %v454_v49 }
 0x131   : > { %v499_v51 = vmax.f32 %v494_v50, 0.0 }
 0x133   : > { %v500_v52 = vpack.c.bf16 %v499_v51, %v499_v51 }
 0x135   : > { %808 = vmatmul.mubr.bf16.vlgmr.msra.gmra.mrb[4].mxu1 %v500_v52 }
 0x208   : > { %v606_v54 = vpop.f32.mrb[4].mxu1 }
 0x209   : > { %v607_v55 = vadd.f32 %v730_v53, %v606_v54  ;;  %v809_v56 = vpop.f32.mrb[5].mxu1 }
 0x20a   : > { %v609_v57 = vpop.f32.mrb[6].mxu1 }
 0x20b   : > { %v612_v58 = vmax.f32 %v607_v55, 0.0  ;;  %v810_v59 = vpop.f32.mrb[7].mxu1 }
 0x20d   : > { %614 = vst.msk [vmem:[%s232_s17] sm:$0xff] %vm613_vm4, %v612_v58 }
 0x20e   : > { %936 = shalt.err (!%p933_p7)
}
 0x20f   : > { %s937_s10 = scalar_lea.hbm %s1168_s30, 128  ;;  %s941_s13 = scalar_lea.hbm %s1215_s5, 256 }
 0x210   : > { %p938_p8 = scmp.ne.s32.totalorder %s1168_s30, %s937_s10  ;;  %p942_p1 = scmp.lt.u32.totalorder %s1168_s30, %s1215_s5 }
 0x211   : > { %p943_p0 = scmp.lt.u32.totalorder %s941_s13, %s937_s10  ;;  %p945_p6 = scmp.lt.u32.totalorder %s937_s10, %s1168_s30 }
 0x212   : > { %p939_p11 = pnand %p938_p8, %p1226_p9 }
 0x213   : > { %p944_p5 = por %p943_p0, %p942_p1 }
 0x214   : > { %p940_p13 = pneg %p939_p11 }
 0x215   : > { %p946_p10 = por %p945_p6, %p944_p5 }
 0x217   : > { %p947_p12 = pnand %p946_p10, %p940_p13 }
 0x219   : > { %950 = shalt.err (!%p947_p12)
}
 0x21a   : > { %816 = dma.vmem_to_hbm [thread:$0]  (%p1226_p9), %s1170_s23, 128, %s1168_s30, %s616_s22  }
 0x21b PF: > { %p828_p2 = scmp.ge.s32.totalorder %s989_s21, 2  ;;  %s641_s16 = sand.u32 1, %s977_s18  }
 0x21c   : > { %p1227_p3 = scmp.ne.s32.totalorder %s1220_s29, 0  ;;  %s642_s17 = scalar_lea.sflag [#allocation4], %s641_s16 }
 0x21e   : > { %p823_p4 = pnand %p828_p2, %p1227_p3 }
 0x220   : > { %972 = dma.done.wait (!%p823_p4), %s642_s17, 128  }
 0x221   : > { %974 = vsyncadd (!%p823_p4), %s642_s17, 4294967168  ;;  %p16_p7 = scmp.ge.s32.totalorder %s1053_s24, 4   ;;  %s1228_s18 = smov %s981_s19 }
 0x222   : > { %s1229_s19 = smov %s985_s20  ;;  %s1230_s20 = smov %s1064_s27 }
 0x223   : > { %s1231_s21 = smov %s1053_s24  ;;  %18 = sbr.rel (!%p16_p7) target bundleno = 4 (0x4), region = 80 }
 0x22a   :  { %647 = vsyncpa [#allocation3], 1 }
 0x22b   :  { %649 = vsyncpa [#allocation3 + $0x1], 1 }
 0x22c   :  { %650 = vsyncpa [#allocation4], 1 }
 0x22d   :  { %652 = vsyncpa [#allocation4 + $0x1], 1 }

</bundles_post_ra>
